<compile_context>
chip_gen: v7x
topology: tpu7x:2x2x1
jax: 0.10.0
libtpu: 0.0.40
codegen_flags: <defaults>
</compile_context>

<pallas_src>
import functools

import jax
import jax.numpy as jnp
import numpy as np
from jax.experimental import pallas as pl
from jax.experimental.pallas import tpu as pltpu


def _dice_sums_kernel(logits_ref, labels_ref, pvol_ref, yvol_ref, inter_ref,
                      *, hw, tile_hw, needs_mask):
    # logits_ref: (1, C, TILE_HW) input dtype (f32 or bf16); softmax done here.
    # labels_ref: (1, 1, TILE_HW) int32
    # *_ref outs: (1, C, 1) float32 accumulators, resident across the HW axis.
    @pl.when(pl.program_id(1) == 0)
    def _():
        pvol_ref[...] = jnp.zeros_like(pvol_ref)
        yvol_ref[...] = jnp.zeros_like(yvol_ref)
        inter_ref[...] = jnp.zeros_like(inter_ref)

    logits = logits_ref[0].astype(jnp.float32)      # (C, TILE_HW)
    labels = labels_ref[0]                          # (1, TILE_HW) int32
    c = logits.shape[0]

    if needs_mask:
        # Last tile may run past HW; zero out padded lanes so they contribute
        # exactly nothing to any of the three sums.
        lane = jax.lax.broadcasted_iota(jnp.int32, (1, tile_hw), 1)
        valid = (pl.program_id(1) * tile_hw + lane) < hw          # (1, TILE_HW)
        logits = jnp.where(valid, logits, 0.0)
        vmask = valid.astype(jnp.float32)

    # Numerically-stable softmax over the class axis (PyTorch Softmax(dim=1)).
    m = jnp.max(logits, axis=0, keepdims=True)      # (1, TILE_HW) sublane reduce
    e = jnp.exp(logits - m)
    p = e * pl.reciprocal(jnp.sum(e, axis=0, keepdims=True), approx=False)

    class_ids = jax.lax.broadcasted_iota(jnp.int32, (c, tile_hw), 0)
    y = (labels == class_ids).astype(jnp.float32)   # one-hot (C, TILE_HW)

    if needs_mask:
        p = p * vmask
        y = y * vmask

    # Per-class reductions over the voxel (lane) axis; accumulate across tiles.
    pvol_ref[...] += jnp.sum(p, axis=1, keepdims=True)[None]        # (1, C, 1)
    yvol_ref[...] += jnp.sum(y, axis=1, keepdims=True)[None]
    inter_ref[...] += jnp.sum(y * p, axis=1, keepdims=True)[None]


def _dice_sums(logits_3d, labels_3d, *, tile_hw=8192):
    """logits_3d: [B, C, HW] (any float dtype); labels_3d: [B, 1, HW] int32.

    Returns three [B, C, 1] float32 partial-sum arrays (p_vol, y_vol, intersect).
    """
    b, c, hw = logits_3d.shape
    # Lane-aligned voxel tile, clamped to the (rounded-up) problem size.
    # VMEM per step is tiny (2 * tile_hw * (C*itemsize + 4) bytes), so the
    # default scoped VMEM limit is plenty on v5e/v6e/v7x at this tile size.
    tile_hw = min(tile_hw, pl.cdiv(hw, 128) * 128)
    grid = (b, pl.cdiv(hw, tile_hw))
    needs_mask = (hw % tile_hw) != 0

    kernel = functools.partial(_dice_sums_kernel, hw=hw, tile_hw=tile_hw,
                               needs_mask=needs_mask)
    out_sds = jax.ShapeDtypeStruct((b, c, 1), jnp.float32)
    out_spec = pl.BlockSpec((1, c, 1), lambda bi, i: (bi, 0, 0))
    return pl.pallas_call(
        kernel,
        out_shape=(out_sds, out_sds, out_sds),
        grid_spec=pltpu.PrefetchScalarGridSpec(
            num_scalar_prefetch=0,
            grid=grid,
            in_specs=[
                pl.BlockSpec((1, c, tile_hw), lambda bi, i: (bi, 0, i)),
                pl.BlockSpec((1, 1, tile_hw), lambda bi, i: (bi, 0, i)),
            ],
            out_specs=(out_spec, out_spec, out_spec),
        ),
        compiler_params=pltpu.CompilerParams(
            # Batch axis shards across TensorCores (v7x megacore); the HW axis
            # carries the per-batch accumulators so it stays "arbitrary".
            dimension_semantics=("parallel", "arbitrary")),
    )(logits_3d, labels_3d)


def weighted_dice_loss(predict, labels, cls_weights):
    """predict: [B, C, H, W] logits; labels: [B, H, W] int; cls_weights: [C]."""
    b, c, h, w = predict.shape
    # Keep NCHW: flattening H*W is a free reshape (no extra HBM transpose pass).
    # Pass predict in its native dtype (bf16 stays bf16); the kernel upcasts.
    logits_3d = predict.reshape(b, c, h * w)
    labels_3d = labels.reshape(b, 1, h * w).astype(jnp.int32)

    pvol_b, yvol_b, inter_b = _dice_sums(logits_3d, labels_3d)
    p_vol = pvol_b.sum(axis=0)[:, 0]        # (C,)
    y_vol = yvol_b.sum(axis=0)[:, 0]
    intersect = inter_b.sum(axis=0)[:, 0]

    dice_score = (2.0 * intersect + 1e-05) / (y_vol + p_vol + 1e-05)
    wts = jnp.asarray(cls_weights, dtype=jnp.float32)
    weighted_dice = dice_score * wts
    avg_dice = weighted_dice.sum() / wts.sum()
    return 1.0 - avg_dice


def _reference_loss(predict, labels, cls_weights):
    c = predict.shape[1]
    p = jax.nn.softmax(predict.astype(jnp.float32), axis=1)
    p2 = jnp.transpose(p, (0, 2, 3, 1)).reshape(-1, c)
    y = jax.nn.one_hot(labels.reshape(-1), c, dtype=jnp.float32)
    y_vol = y.sum(0)
    p_vol = p2.sum(0)
    inter = (y * p2).sum(0)
    dice = (2.0 * inter + 1e-05) / (y_vol + p_vol + 1e-05)
    w = jnp.asarray(cls_weights, dtype=jnp.float32)
    return 1.0 - (dice * w).sum() / w.sum()


if __name__ == "__main__":
    key = jax.random.PRNGKey(0)
    k1, k2 = jax.random.split(key)

    B, C, H, W = 2, 4, 16, 16
    predict = jax.random.normal(k1, (B, C, H, W), dtype=jnp.float32)
    labels = jax.random.randint(k2, (B, H, W), 0, C, dtype=jnp.int32)

    # Deterministic "parameters" of the module (cls_num, cls_weights).
    cls_weights = [1.0, 2.0, 3.0, 4.0]

    loss = weighted_dice_loss(predict, labels, cls_weights)
    loss = jax.block_until_ready(loss)

    ref = jax.block_until_ready(_reference_loss(predict, labels, cls_weights))
    np.testing.assert_allclose(np.asarray(loss), np.asarray(ref),
                               rtol=1e-5, atol=1e-5)
    print("KERNEL_OK")
</pallas_src>

<mosaic_0001>
module attributes {stable_mosaic.version = 11 : i64} {
  func.func @_dice_sums_kernel(%arg0: i32, %arg1: i32, %arg2: memref<1x4x256xf32, #tpu.memory_space<vmem>>, %arg3: memref<1x1x256xi32, #tpu.memory_space<vmem>>, %arg4: memref<1x4x1xf32, #tpu.memory_space<vmem>>, %arg5: memref<1x4x1xf32, #tpu.memory_space<vmem>>, %arg6: memref<1x4x1xf32, #tpu.memory_space<vmem>>) attributes {dimension_semantics = [#tpu.dimension_semantics<parallel>, #tpu.dimension_semantics<arbitrary>], iteration_bounds = array<i64: 2, 1>, scalar_prefetch = 0 : i64, scratch_operands = 0 : i64, tpu.core_type = #tpu.core_type<tc>, window_params = [{transform_indices = @transform_0, window_bounds = array<i64: 1, 4, 256>}, {transform_indices = @transform_1, window_bounds = array<i64: 1, 1, 256>}, {transform_indices = @transform_2, window_bounds = array<i64: 1, 4, 1>}, {transform_indices = @transform_3, window_bounds = array<i64: 1, 4, 1>}, {transform_indices = @transform_4, window_bounds = array<i64: 1, 4, 1>}]} {
    %c0_i32 = arith.constant 0 : i32
    %0 = arith.cmpi eq, %arg1, %c0_i32 : i32
    %1 = arith.extui %0 : i1 to i32
    %c0_i32_0 = arith.constant 0 : i32
    %2 = arith.cmpi ne, %1, %c0_i32_0 : i32
    scf.if %2 {
      %cst_28 = arith.constant 0.000000e+00 : f32
      %41 = vector.broadcast %cst_28 : f32 to vector<1x4x1xf32>
      %c0_29 = arith.constant 0 : index
      %c0_30 = arith.constant 0 : index
      %c0_31 = arith.constant 0 : index
      %42 = vector.load %arg4[%c0_29, %c0_30, %c0_31] : memref<1x4x1xf32, #tpu.memory_space<vmem>>, vector<1x4x1xf32>
      tpu.vector_store %arg4[%c0_29, %c0_30, %c0_31], %41 {strides = array<i32>} : memref<1x4x1xf32, #tpu.memory_space<vmem>>, vector<1x4x1xf32>,
      %cst_32 = arith.constant 0.000000e+00 : f32
      %43 = vector.broadcast %cst_32 : f32 to vector<1x4x1xf32>
      %c0_33 = arith.constant 0 : index
      %c0_34 = arith.constant 0 : index
      %c0_35 = arith.constant 0 : index
      %44 = vector.load %arg5[%c0_33, %c0_34, %c0_35] : memref<1x4x1xf32, #tpu.memory_space<vmem>>, vector<1x4x1xf32>
      tpu.vector_store %arg5[%c0_33, %c0_34, %c0_35], %43 {strides = array<i32>} : memref<1x4x1xf32, #tpu.memory_space<vmem>>, vector<1x4x1xf32>,
      %cst_36 = arith.constant 0.000000e+00 : f32
      %45 = vector.broadcast %cst_36 : f32 to vector<1x4x1xf32>
      %c0_37 = arith.constant 0 : index
      %c0_38 = arith.constant 0 : index
      %c0_39 = arith.constant 0 : index
      %46 = vector.load %arg6[%c0_37, %c0_38, %c0_39] : memref<1x4x1xf32, #tpu.memory_space<vmem>>, vector<1x4x1xf32>
      tpu.vector_store %arg6[%c0_37, %c0_38, %c0_39], %45 {strides = array<i32>} : memref<1x4x1xf32, #tpu.memory_space<vmem>>, vector<1x4x1xf32>,
    } else {
    }
    %c0 = arith.constant 0 : index
    %c0_1 = arith.constant 0 : index
    %c0_2 = arith.constant 0 : index
    %3 = vector.load %arg2[%c0, %c0_1, %c0_2] : memref<1x4x256xf32, #tpu.memory_space<vmem>>, vector<1x4x256xf32>
    %4 = vector.shape_cast %3 : vector<1x4x256xf32> to vector<4x256xf32>
    %c0_3 = arith.constant 0 : index
    %c0_4 = arith.constant 0 : index
    %c0_5 = arith.constant 0 : index
    %5 = vector.load %arg3[%c0_3, %c0_4, %c0_5] : memref<1x1x256xi32, #tpu.memory_space<vmem>>, vector<1x1x256xi32>
    %6 = vector.shape_cast %5 : vector<1x1x256xi32> to vector<1x256xi32>
    %cst = arith.constant dense<0xFF800000> : vector<256xf32>
    %7 = vector.multi_reduction <maximumf>, %4, %cst [0] : vector<4x256xf32> to vector<256xf32>
    %8 = vector.shape_cast %7 : vector<256xf32> to vector<1x256xf32>
    %9 = vector.broadcast %8 : vector<1x256xf32> to vector<4x256xf32>
    %10 = arith.subf %4, %9 : vector<4x256xf32>
    %11 = math.exp %10 : vector<4x256xf32>
    %cst_6 = arith.constant dense<0.000000e+00> : vector<256xf32>
    %12 = vector.multi_reduction <add>, %11, %cst_6 [0] : vector<4x256xf32> to vector<256xf32>
    %13 = vector.shape_cast %12 : vector<256xf32> to vector<1x256xf32>
    %14 = tpu.reciprocal %13 : vector<1x256xf32> -> vector<1x256xf32>
    %15 = vector.broadcast %14 : vector<1x256xf32> to vector<4x256xf32>
    %16 = arith.mulf %11, %15 : vector<4x256xf32>
    %17 = tpu.iota {dimensions = array<i32: 0>} : vector<4x256xi32>
    %18 = vector.broadcast %6 : vector<1x256xi32> to vector<4x256xi32>
    %19 = arith.cmpi eq, %18, %17 : vector<4x256xi32>
    %20 = arith.extui %19 : vector<4x256xi1> to vector<4x256xi32>
    %21 = arith.sitofp %20 : vector<4x256xi32> to vector<4x256xf32>
    %c0_7 = arith.constant 0 : index
    %c0_8 = arith.constant 0 : index
    %c0_9 = arith.constant 0 : index
    %22 = vector.load %arg4[%c0_7, %c0_8, %c0_9] : memref<1x4x1xf32, #tpu.memory_space<vmem>>, vector<1x4x1xf32>
    %cst_10 = arith.constant dense<0.000000e+00> : vector<4xf32>
    %23 = vector.multi_reduction <add>, %16, %cst_10 [1] : vector<4x256xf32> to vector<4xf32>
    %24 = vector.shape_cast %23 : vector<4xf32> to vector<4x1xf32>
    %25 = vector.shape_cast %24 : vector<4x1xf32> to vector<1x4x1xf32>
    %26 = arith.addf %22, %25 : vector<1x4x1xf32>
    %c0_11 = arith.constant 0 : index
    %c0_12 = arith.constant 0 : index
    %c0_13 = arith.constant 0 : index
    %27 = vector.load %arg4[%c0_11, %c0_12, %c0_13] : memref<1x4x1xf32, #tpu.memory_space<vmem>>, vector<1x4x1xf32>
    tpu.vector_store %arg4[%c0_11, %c0_12, %c0_13], %26 {strides = array<i32>} : memref<1x4x1xf32, #tpu.memory_space<vmem>>, vector<1x4x1xf32>,
    %c0_14 = arith.constant 0 : index
    %c0_15 = arith.constant 0 : index
    %c0_16 = arith.constant 0 : index
    %28 = vector.load %arg5[%c0_14, %c0_15, %c0_16] : memref<1x4x1xf32, #tpu.memory_space<vmem>>, vector<1x4x1xf32>
    %cst_17 = arith.constant dense<0.000000e+00> : vector<4xf32>
    %29 = vector.multi_reduction <add>, %21, %cst_17 [1] : vector<4x256xf32> to vector<4xf32>
    %30 = vector.shape_cast %29 : vector<4xf32> to vector<4x1xf32>
    %31 = vector.shape_cast %30 : vector<4x1xf32> to vector<1x4x1xf32>
    %32 = arith.addf %28, %31 : vector<1x4x1xf32>
    %c0_18 = arith.constant 0 : index
    %c0_19 = arith.constant 0 : index
    %c0_20 = arith.constant 0 : index
    %33 = vector.load %arg5[%c0_18, %c0_19, %c0_20] : memref<1x4x1xf32, #tpu.memory_space<vmem>>, vector<1x4x1xf32>
    tpu.vector_store %arg5[%c0_18, %c0_19, %c0_20], %32 {strides = array<i32>} : memref<1x4x1xf32, #tpu.memory_space<vmem>>, vector<1x4x1xf32>,
    %c0_21 = arith.constant 0 : index
    %c0_22 = arith.constant 0 : index
    %c0_23 = arith.constant 0 : index
    %34 = vector.load %arg6[%c0_21, %c0_22, %c0_23] : memref<1x4x1xf32, #tpu.memory_space<vmem>>, vector<1x4x1xf32>
    %35 = arith.mulf %21, %16 : vector<4x256xf32>
    %cst_24 = arith.constant dense<0.000000e+00> : vector<4xf32>
    %36 = vector.multi_reduction <add>, %35, %cst_24 [1] : vector<4x256xf32> to vector<4xf32>
    %37 = vector.shape_cast %36 : vector<4xf32> to vector<4x1xf32>
    %38 = vector.shape_cast %37 : vector<4x1xf32> to vector<1x4x1xf32>
    %39 = arith.addf %34, %38 : vector<1x4x1xf32>
    %c0_25 = arith.constant 0 : index
    %c0_26 = arith.constant 0 : index
    %c0_27 = arith.constant 0 : index
    %40 = vector.load %arg6[%c0_25, %c0_26, %c0_27] : memref<1x4x1xf32, #tpu.memory_space<vmem>>, vector<1x4x1xf32>
    tpu.vector_store %arg6[%c0_25, %c0_26, %c0_27], %39 {strides = array<i32>} : memref<1x4x1xf32, #tpu.memory_space<vmem>>, vector<1x4x1xf32>,
    return
  }
  func.func @transform_0(%arg0: i32, %arg1: i32) -> (i32, i32, i32) {
    %c0_i32 = arith.constant 0 : i32
    %c0_i32_0 = arith.constant 0 : i32
    return %arg0, %c0_i32, %arg1 : i32, i32, i32
  }
  func.func @transform_1(%arg0: i32, %arg1: i32) -> (i32, i32, i32) {
    %c0_i32 = arith.constant 0 : i32
    %c0_i32_0 = arith.constant 0 : i32
    return %arg0, %c0_i32, %arg1 : i32, i32, i32
  }
  func.func @transform_2(%arg0: i32, %arg1: i32) -> (i32, i32, i32) {
    %c0_i32 = arith.constant 0 : i32
    %c0_i32_0 = arith.constant 0 : i32
    %c0_i32_1 = arith.constant 0 : i32
    return %arg0, %c0_i32, %c0_i32_0 : i32, i32, i32
  }
  func.func @transform_3(%arg0: i32, %arg1: i32) -> (i32, i32, i32) {
    %c0_i32 = arith.constant 0 : i32
    %c0_i32_0 = arith.constant 0 : i32
    %c0_i32_1 = arith.constant 0 : i32
    return %arg0, %c0_i32, %c0_i32_0 : i32, i32, i32
  }
  func.func @transform_4(%arg0: i32, %arg1: i32) -> (i32, i32, i32) {
    %c0_i32 = arith.constant 0 : i32
    %c0_i32_0 = arith.constant 0 : i32
    %c0_i32_1 = arith.constant 0 : i32
    return %arg0, %c0_i32, %c0_i32_0 : i32, i32, i32
  }
}

</mosaic_0001>

<bundles_post_ra>
// kernel: tpu_custom_call.1
= control target key start
LH: loop header
LB: loop body
LE: loop exit
PB: predicated region body
PF: predicated region fallthrough
CT: control target
= control target key end

     0   :  { %10 = vsyncpa [#allocation3], 0  ;;  %s1004_s0 = inlined_call_operand.hbm [shape: f32[2,4,256], index: 0, kind: input, shape index: {}]   ;;  %s1005_s1 = inlined_call_operand.hbm [shape: s32[2,1,256], index: 1, kind: input, shape index: {}]   ;;  %s1006_s2 = inlined_call_operand.vmem [shape: f32[2,4,1], index: 2, kind: output, shape index: {0}]   ;;  %s1007_s3 = inlined_call_operand.vmem [shape: f32[2,4,1], index: 3, kind: output, shape index: {1}]   ;;  %s1008_s4 = inlined_call_operand.vmem [shape: f32[2,4,1], index: 4, kind: output, shape index: {2}]  }
   0x1   :  { %12 = vsyncpa [#allocation3 + $0x1], 0 }
   0x2   :  { %13 = vsyncpa [#allocation5], 0 }
   0x3   :  { %15 = vsyncpa [#allocation5 + $0x1], 0  ;;  %s798_s15 = smov 0   ;;  %s800_s16 = smov 0  }
   0x4   :  { %s802_s17 = smov 0   ;;  %s804_s18 = smov 0  }
   0x5   :  { %s806_s19 = smov 0   ;;  %s808_s20 = smov 0  }
   0x6 LB: > { %s564_s21 = sadd.s32 4294967295, %s768_s20   ;;  %s33_s22 = sadd.s32 1, %s764_s19  ;;  %s768_s20 = sphi %s808_s20, %s21_s20   ;;  %s764_s19 = sphi %s806_s19, %s1022_s19   ;;  %s760_s18 = sphi %s804_s18, %s1021_s18   ;;  %s756_s17 = sphi %s802_s17, %s1020_s17   ;;  %s752_s16 = sphi %s800_s16, %s1019_s16   ;;  %s748_s15 = sphi %s798_s15, %s1018_s15  }
   0x7   : > { %p35_p0 = scmp.ge.s32.totalorder %s33_s22, 2  ;;  %s42_s23 = sadd.s32 1, %s756_s17 }
   0x8   : > { %p49_p1 = scmp.ne.s32.totalorder %s756_s17, %s752_s16  ;;  %p50_p2 = scmp.eq.s32.totalorder %s768_s20, 0 }
   0x9   : > { %s1024_s22 = smov (%p35_p0, %s33_s22), 0  ;;  %p55_p4 = scmp.ne.s32.totalorder %s752_s16, %s748_s15 }
   0xa   : > { %p834_p3 = por %p50_p2, %p49_p1  ;;  %s37_s25 = ssub.s32 %s764_s19, %s1024_s22 }
   0xb   : > { %p56_p5 = scmp.eq.s32.totalorder %s564_s21, 0  ;;  %p40_p6 = scmp.eq.s32.totalorder %s37_s25, 0 }
   0xc   : > { %p597_p8 = scmp.lt.s32.totalorder %s768_s20, 2  ;;  %s850_s28 = sand.u32 1, %s756_s17  }
   0xd   : > { %p841_p7 = por %p56_p5, %p55_p4  ;;  %s584_s29 = sshll.u32 %s764_s19, 7 }
   0xe   : > { %s847_s27 = scalar_select %p40_p6, %s756_s17, %s42_s23  }
   0xf   : > { %s1011_s26 = scalar_select %p841_p7, 1, 0 }
  0x10   : > { %s568_s30 = sshll.u32 %s850_s28, 3  ;;  %s857_s7 = scalar_lea.hbm %s1004_s0, %s584_s29 }
  0x11   : > { %s189_s8 = scalar_lea.vmem [#allocation2], %s568_s30  ;;  %p861_p9 = pnand %p597_p8, %p834_p3 }
  0x12   : > { %s199_s9 = sshll.u32 %s189_s8, 4  ;;  %s186_s11 = scalar_lea.sflag [#allocation3], %s850_s28  ;;  %s865_s9 = int_to_ptr.vmem [resolvable:$true] %s199_s9 }
  0x13   : > { %s654_s12 = scalar_lea.hbm %s857_s7, 128  ;;  %p656_p13 = pneg %p861_p9 }
  0x14   : > { %p655_p12 = scmp.ne.s32.totalorder %s857_s7, %s654_s12  ;;  %s659_s15 = scalar_lea.hbm %s1004_s0, 256 }
  0x15   : > { %p660_p2 = scmp.lt.u32.totalorder %s857_s7, %s1004_s0  ;;  %p661_p3 = scmp.lt.u32.totalorder %s659_s15, %s654_s12 }
  0x16   : > { %p657_p0 = pnand %p656_p13, %p655_p12  ;;  %p663_p5 = scmp.lt.u32.totalorder %s654_s12, %s857_s7 }
  0x17   : > { %p662_p4 = por %p661_p3, %p660_p2 }
  0x18   : > { %p658_p1 = pneg %p657_p0 }
  0x19   : > { %p664_p6 = por %p663_p5, %p662_p4 }
  0x1b   : > { %p665_p8 = pnand %p664_p6, %p658_p1 }
  0x1d   : > { %668 = shalt.err (!%p665_p8)
}
  0x1e   : > { %s669_s24 = scalar_lea.vmem %s865_s9, 128  ;;  %s770_s25 = smov [#allocation2]  }
  0x1f   : > { %p670_p12 = scmp.ne.s32.totalorder %s865_s9, %s669_s24  ;;  %s674_s29 = sshll.u32 %s770_s25, 4  ;;  %s675_s29 = int_to_ptr.vmem [resolvable:$false] %s674_s29 }
  0x20   : > { %s676_s30 = scalar_lea.vmem %s675_s29, 256  ;;  %p677_p11 = scmp.lt.s32.totalorder %s865_s9, %s675_s29 }
  0x21   : > { %p672_p0 = pnand %p670_p12, %p656_p13  ;;  %p678_p2 = scmp.lt.s32.totalorder %s676_s30, %s669_s24 }
  0x23   : > { %p673_p10 = pneg %p672_p0  ;;  %p679_p3 = por %p678_p2, %p677_p11 }
  0x25   : > { %p680_p4 = pnand %p679_p3, %p673_p10 }
  0x27   : > { %683 = shalt.err (!%p680_p4)
}
  0x28   : > { %593 = dma.hbm_to_vmem [thread:$0]  (!%p861_p9), %s857_s7, 128, %s865_s9, %s186_s11  }
  0x29   : > { %p1013_p1 = scmp.lt.s32.totalorder %s768_s20, 3  ;;  %p1014_p5 = scmp.ge.s32.totalorder %s768_s20, 1 }
  0x2a   : > { %s571_s6 = sshll.u32 %s850_s28, 1  ;;  %s585_s8 = sshll.u32 %s764_s19, 5 }
  0x2b   : > { %p899_p6 = pnand %p1014_p5, %p1013_p1  ;;  %s908_s14 = scalar_lea.hbm %s1005_s1, %s585_s8 }
  0x2c   : > { %s210_s15 = scalar_lea.vmem [#allocation4], %s571_s6  ;;  %s207_s7 = scalar_lea.sflag [#allocation5], %s850_s28 }
  0x2d   : > { %s1015_s5 = scalar_select %p899_p6, 1, 0 }
  0x2e   : > { %s220_s21 = sshll.u32 %s210_s15, 4  ;;  %s684_s9 = scalar_lea.hbm %s908_s14, 32  ;;  %s221_s21 = int_to_ptr.vmem [resolvable:$true] %s220_s21 }
  0x2f   : > { %p685_p10 = scmp.ne.s32.totalorder %s908_s14, %s684_s9  ;;  %s689_s24 = scalar_lea.hbm %s1005_s1, 64 }
  0x30   : > { %p690_p12 = scmp.lt.u32.totalorder %s908_s14, %s1005_s1  ;;  %p691_p0 = scmp.lt.u32.totalorder %s689_s24, %s684_s9 }
  0x31   : > { %p687_p11 = pnand %p685_p10, %p656_p13  ;;  %p693_p3 = scmp.lt.u32.totalorder %s684_s9, %s908_s14 }
  0x32   : > { %p692_p2 = por %p691_p0, %p690_p12 }
  0x33   : > { %p688_p8 = pneg %p687_p11 }
  0x34   : > { %p694_p4 = por %p693_p3, %p692_p2 }
  0x36   : > { %p695_p1 = pnand %p694_p4, %p688_p8 }
  0x38   : > { %698 = shalt.err (!%p695_p1)
}
  0x39   : > { %s699_s28 = scalar_lea.vmem %s221_s21, 32  ;;  %s771_s30 = smov [#allocation4]  }
  0x3a   : > { %p700_p5 = scmp.ne.s32.totalorder %s221_s21, %s699_s28  ;;  %s704_s6 = sshll.u32 %s771_s30, 4  ;;  %s705_s6 = int_to_ptr.vmem [resolvable:$false] %s704_s6 }
  0x3b   : > { %s706_s8 = scalar_lea.vmem %s705_s6, 64  ;;  %p707_p7 = scmp.lt.s32.totalorder %s221_s21, %s705_s6 }
  0x3c   : > { %p702_p10 = pnand %p700_p5, %p656_p13  ;;  %p708_p6 = scmp.lt.s32.totalorder %s706_s8, %s699_s28 }
  0x3e   : > { %p703_p11 = pneg %p702_p10  ;;  %p709_p0 = por %p708_p6, %p707_p7 }
  0x40   : > { %p710_p12 = pnand %p709_p0, %p703_p11 }
  0x42   : > { %713 = shalt.err (!%p710_p12)
}
  0x43   : > { %596 = dma.hbm_to_vmem [thread:$0]  (!%p861_p9), %s908_s14, 32, %s221_s21, %s207_s7  }
  0x44   : > { %p1016_p8 = scmp.ne.s32.totalorder %s1015_s5, 0 }
  0x45   : > { %s231_s12 = sand.u32 (!%p1016_p8), 1, %s752_s16   ;;  %p1017_p13 = scmp.ne.s32.totalorder (!%p1016_p8), %s1011_s26, 0 }
  0x46   : > { %229 = sbr.rel (%p1016_p8) target bundleno = 298 (0x12a), region = 28  ;;  %s575_s13 = sshll.u32 (!%p1016_p8), %s231_s12, 3 }
  0x47   : > { %s232_s15 = scalar_lea.sflag (!%p1016_p8), [#allocation3], %s231_s12  ;;  %s235_s9 = scalar_lea.vmem (!%p1016_p8), [#allocation2], %s575_s13 }
  0x4d   : > { %739 = dma.done.wait (%p1017_p13), %s232_s15, 128  }
  0x4e   : > { %741 = vsyncadd (%p1017_p13), %s232_s15, 4294967168  ;;  %s576_s11 = sshll.u32 %s231_s12, 1  ;;  %s241_s23 = scalar_lea.sflag [#allocation5], %s231_s12 }
  0x4f   : > { %s937_s10 = scalar_lea.vmem [#allocation4], %s576_s11 }
  0x50   : > { %743 = dma.done.wait (%p1017_p13), %s241_s23, 32  }
  0x51   : > { %745 = vsyncadd (%p1017_p13), %s241_s23, 4294967264  ;;  %p283_p7 = scmp.lt.s32.totalorder %s760_s18, 1  ;;  %vm299_vm0 = vcmask 3072   ;;  %vm308_vm1 = vcmask 1043456   ;;  %v772_v0 = vmov 0.0   ;;  %v303_v1 = vld [vmem:[%s235_s9] sm:$0xff]  ;;  %v354_v31 = vlaneseq }
  0x52   : > { %v306_v2 = vcombine.high %v303_v1, %v303_v1  ;;  %v309_v3 = vsel %vm308_vm1, %v303_v1, -inf  ;;  %v304_v39 = vld [vmem:[%s937_s10] sm:$0x3] }
  0x53   : > { %s1026_s18 = smov (!%p283_p7, %s760_s18), 1  ;;  %v310_v4 = vrot.slane %v309_v3, 4  ;;  %v355_v36 = vshrl.u32 %v354_v31, 7 }
  0x54   : > { %s945_s5 = sshll.u32 %s1026_s18, 2  ;;  %v316_v5 = vsel %vm308_vm1, %v306_v2, -inf }
  0x55   : > { %s951_s7 = scalar_lea.vmem %s1006_s2, %s945_s5  ;;  %v311_v6 = vmax.f32 %v309_v3, %v310_v4  ;;  %v317_v7 = vrot.slane %v316_v5, 4  ;;  %v358_v38 = vsub.s32 0, %v355_v36  ;;  %v362_v40 = vsub.s32 1, %v355_v36  ;;  %s294_s24 = scalar_lea.vmem %s1008_s4, %s945_s5 }
  0x56   : > { %300 = vst.msk [vmem:[%s951_s7] sm:$0xf] %vm299_vm0, %v772_v0  ;;  %s290_s28 = scalar_lea.vmem %s1007_s3, %s945_s5  ;;  %302 = vst.msk [vmem:[%s294_s24] sm:$0xf] %vm299_vm0, %v772_v0 }
  0x57   : > { %v312_v8 = vrot.slane %v311_v6, 2  ;;  %v318_v9 = vmax.f32 %v316_v5, %v317_v7  ;;  %v359_v41 = vrot.slane %v304_v39, %v358_v38  ;;  %v363_v42 = vrot.slane %v304_v39, %v362_v40  ;;  %301 = vst.msk [vmem:[%s290_s28] sm:$0xf] %vm299_vm0, %v772_v0 }
  0x59   : > { %v313_v10 = vmax.f32 %v311_v6, %v312_v8  ;;  %v319_v11 = vrot.slane %v318_v9, 2  ;;  %vm364_vm2 = vcmp.eq.s32.totalorder %v359_v41, %v355_v36  ;;  %vm365_vm3 = vcmp.eq.s32.totalorder %v363_v42, %v355_v36 }
  0x5a   : > { %v580_v46 = vsel %vm364_vm2, 1.0, %v772_v0  ;;  %v581_v48 = vsel %vm365_vm3, 1.0, %v772_v0 }
  0x5b   : > { %v314_v12 = vrot.slane %v313_v10, 1  ;;  %v320_v13 = vmax.f32 %v318_v9, %v319_v11  ;;  %v383_v52 = vsel %vm308_vm1, %v580_v46, 0.0  ;;  %v384_v56 = vsel %vm308_vm1, %v581_v48, 0.0 }
  0x5c   : > { %v385_v60 = vadd.f32 %v384_v56, %v383_v52 }
  0x5d   : > { %v315_v14 = vmax.f32 %v313_v10, %v314_v12  ;;  %v321_v15 = vrot.slane %v320_v13, 1  ;;  %v370_v61 = vld [vmem:[%s951_s7] sm:$0xf] }
  0x5e   : > { %v390_v63 = vld [vmem:[%s294_s24] sm:$0xf] }
  0x5f   : > { %v322_v16 = vmax.f32 %v320_v13, %v321_v15  ;;  %v382_v3 = vld [vmem:[%s290_s28] sm:$0xf] }
  0x61   : > { %v325_v17 = vcombine.low %v315_v14, %v322_v16 }
  0x63   : > { %v327_v18 = vsub.f32 %v303_v1, %v325_v17 }
  0x65   : > { %v328_v19 = vmul.f32 1.442695, %v327_v18 }
  0x67   : > { %648 = vpow2.f32 %v328_v19 }
  0x71   : > { %v649_v20 = vpop.eup %648 }
  0x72   : > { %v331_v21 = vcombine.high %v649_v20, %v649_v20  ;;  %v333_v22 = vsel %vm308_vm1, %v649_v20, 0.0 }
  0x73   : > { %v334_v23 = vrot.slane %v333_v22, 4 }
  0x74   : > { %v340_v24 = vsel %vm308_vm1, %v331_v21, 0.0 }
  0x75   : > { %v335_v25 = vadd.f32 %v334_v23, %v333_v22  ;;  %v341_v26 = vrot.slane %v340_v24, 4 }
  0x77   : > { %v336_v27 = vrot.slane %v335_v25, 2  ;;  %v342_v28 = vadd.f32 %v341_v26, %v340_v24 }
  0x79   : > { %v337_v29 = vadd.f32 %v336_v27, %v335_v25  ;;  %v343_v30 = vrot.slane %v342_v28, 2 }
  0x7b   : > { %v338_v32 = vrot.slane %v337_v29, 1  ;;  %v344_v33 = vadd.f32 %v343_v30, %v342_v28 }
  0x7d   : > { %v339_v34 = vadd.f32 %v338_v32, %v337_v29  ;;  %v345_v35 = vrot.slane %v344_v33, 1 }
  0x7f   : > { %v346_v37 = vadd.f32 %v345_v35, %v344_v33  ;;  %650 = vrcp.f32 %v339_v34 }
  0x81   : > { %652 = vrcp.f32 %v346_v37 }
  0x89   : > { %v651_v43 = vpop.eup %650 }
  0x8b   : > { %v653_v44 = vpop.eup %652 }
  0x8c   : > { %v351_v45 = vcombine.low %v651_v43, %v653_v44 }
  0x8e   : > { %v353_v47 = vmul.f32 %v649_v20, %v351_v45 }
  0x90   : > { %v372_v49 = vcombine.high %v353_v47, %v353_v47  ;;  %v374_v50 = vsel %vm308_vm1, %v353_v47, 0.0  ;;  %v391_v51 = vmul.f32 %v580_v46, %v353_v47 }
  0x92   : > { %v375_v53 = vsel %vm308_vm1, %v372_v49, 0.0  ;;  %v392_v54 = vmul.f32 %v581_v48, %v372_v49  ;;  %v393_v55 = vsel %vm308_vm1, %v391_v51, 0.0 }
  0x93   : > { %v376_v57 = vadd.f32 %v375_v53, %v374_v50 }
  0x94   : > { %v394_v58 = vsel %vm308_vm1, %v392_v54, 0.0 }
  0x95   : > { %377 = vadd.xlane.f32.xlu0 %v376_v57  ;;  %v395_v59 = vadd.f32 %v394_v58, %v393_v55 }
  0x97   : > { %396 = vadd.xlane.f32.xlu1 %v395_v59 }
  0x99   : > { %386 = vadd.xlane.f32.xlu0 %v385_v60 }
 0x122   : > { %v378_v62 = vpop.xlane.xlu0 %377 }
 0x123   : > { %v379_v1 = vadd.f32 %v378_v62, %v370_v61 }
 0x124   : > { %v397_v2 = vpop.xlane.xlu1 %396 }
 0x125   : > { %381 = vst.msk [vmem:[%s951_s7] sm:$0xf] %vm299_vm0, %v379_v1  ;;  %v398_v4 = vadd.f32 %v397_v2, %v390_v63 }
 0x126   : > { %v387_v5 = vpop.xlane.xlu0 %386 }
 0x127   : > { %399 = vst.msk [vmem:[%s294_s24] sm:$0xf] %vm299_vm0, %v398_v4  ;;  %v388_v6 = vadd.f32 %v387_v5, %v382_v3 }
 0x129   : > { %389 = vst.msk [vmem:[%s290_s28] sm:$0xf] %vm299_vm0, %v388_v6 }
 0x12a PF: > { %s21_s20 = sadd.s32 1, %s768_s20   ;;  %s1018_s15 = smov %s752_s16 }
 0x12b   : > { %p18_p9 = scmp.ge.s32.totalorder %s21_s20, 4   ;;  %s1019_s16 = smov %s756_s17 }
 0x12c   : > { %s1020_s17 = smov %s847_s27  ;;  %s1021_s18 = smov %s764_s19 }
 0x12d   : > { %s1022_s19 = smov %s1024_s22  ;;  %20 = sbr.rel (!%p18_p9) target bundleno = 6 (0x6), region = 109 }
 0x134   :  { %447 = vsyncpa [#allocation3], 1 }
 0x135   :  { %449 = vsyncpa [#allocation3 + $0x1], 1 }
 0x136   :  { %450 = vsyncpa [#allocation5], 1 }
 0x137   :  { %452 = vsyncpa [#allocation5 + $0x1], 1 }

</bundles_post_ra>
